<compile_context>
chip_gen: v7x
topology: tpu7x:2x2x1
jax: 0.10.0
libtpu: 0.0.40
codegen_flags: <defaults>
</compile_context>

<pallas_src>
import functools

import jax
import jax.numpy as jnp
from jax import lax
from jax.experimental import pallas as pl
from jax.experimental.pallas import tpu as pltpu

_LANES = 128


def _iou_sums_kernel(pr_ref, gt_ref, inter_ref, sgt_ref, spr_ref,
                     *, threshold, hw, rt, acc_r, needs_mask):
    """One (C, rt, 128) spatial tile of one batch element.

    Grid = (N, num_spatial_tiles); accumulates directly into the resident
    (C, acc_r, 128) output blocks (same block index across the reduction axis).
    """
    s = pl.program_id(1)
    num_s = pl.num_programs(1)

    # Reset the per-batch-element accumulators at the start of the reduction.
    @pl.when(s == 0)
    def _():
        inter_ref[...] = jnp.zeros_like(inter_ref)
        sgt_ref[...] = jnp.zeros_like(sgt_ref)
        spr_ref[...] = jnp.zeros_like(spr_ref)

    logits = pr_ref[...].astype(jnp.float32)          # (C, rt, 128)
    gt = gt_ref[...].astype(jnp.float32)              # (C, rt, 128)
    C = logits.shape[0]

    # Channel softmax with channel as the LEADING axis: elementwise max/add
    # across C vreg slabs -> pure VPU, no cross-sublane XLU reductions.
    m = jnp.max(logits, axis=0, keepdims=True)        # (1, rt, 128)
    e = jnp.exp(logits - m)
    denom = jnp.sum(e, axis=0, keepdims=True)         # (1, rt, 128)
    p = e * pl.reciprocal(denom, approx=False)        # exact; divide off VALU

    if threshold is not None:                         # static Python branch
        p = (p > threshold).astype(jnp.float32)

    folds = rt // acc_r

    def _fold(x):
        # Fold rt rows into the acc_r-row accumulator: pure vreg adds
        # (the (folds, acc_r, 128) split keeps (8,128) tiles intact).
        if folds == 1:
            return x
        return jnp.sum(x.reshape(C, folds, acc_r, _LANES), axis=1)

    def _accumulate(p_v, gt_v):
        inter_ref[...] += _fold(gt_v * p_v)
        sgt_ref[...] += _fold(gt_v)
        spr_ref[...] += _fold(p_v)

    if needs_mask:
        # Only the last spatial tile contains padded lanes / out-of-range
        # rows; keep the iota+compare+select chain out of the steady state.
        @pl.when(s != num_s - 1)
        def _():
            _accumulate(p, gt)

        @pl.when(s == num_s - 1)
        def _():
            row = lax.broadcasted_iota(jnp.int32, (1, rt, _LANES), 1)
            lane = lax.broadcasted_iota(jnp.int32, (1, rt, _LANES), 2)
            valid = (s * rt + row) * _LANES + lane < hw
            # Mask both p and gt: padded/garbage columns must not poison sums.
            _accumulate(jnp.where(valid, p, 0.0), jnp.where(valid, gt, 0.0))
    else:
        _accumulate(p, gt)


def _default_vmem_budget_bytes():
    """Per-generation budget for (2 input streams x 2 buffers + f32 temps)."""
    try:
        phys = getattr(pltpu.get_tpu_info(), "vmem_capacity_bytes",
                       128 * 1024 * 1024)
    except Exception:
        phys = 128 * 1024 * 1024
    if phys <= 64 * 1024 * 1024:        # v7x: 64 MiB physical VMEM
        return 20 * 1024 * 1024
    return 24 * 1024 * 1024             # v5e / v6e: 128 MiB physical VMEM


def iou_metric(input_nchw, target_nchw, *, threshold=None, eps=1e-7,
               vmem_budget_bytes=None):
    """JAX/Pallas equivalent of IoU().forward(input, target).

    Inputs may be f32 or bf16 (bf16 halves HBM traffic; upcast is in-kernel).
    """
    N, C, H, W = input_nchw.shape
    if C < 2:
        raise ValueError("IoU metric averages classes 1..C-1; need C >= 2.")
    HW = H * W

    # View spatial pixels as (rows of 128 lanes): sublane+lane dense blocks.
    R = pl.cdiv(HW, _LANES)
    hw_pad = R * _LANES
    pr = input_nchw.reshape(N, C, HW)
    gt = target_nchw.reshape(N, C, HW)
    if hw_pad != HW:
        # Rare fallback (HW not a multiple of 128): pad tail; padded columns
        # are masked out inside the kernel on the last reduction step.
        pr = jnp.pad(pr, ((0, 0), (0, 0), (0, hw_pad - HW)))
        gt = jnp.pad(gt, ((0, 0), (0, 0), (0, hw_pad - HW)))
    pr = pr.reshape(N, C, R, _LANES)
    gt = gt.reshape(N, C, R, _LANES)

    if vmem_budget_bytes is None:
        vmem_budget_bytes = _default_vmem_budget_bytes()

    # Tile sizing: 2 input streams x 2 pipeline buffers PLUS ~6 full-block
    # f32 temporaries (upcasts of both inputs, e, p, gt*p, headroom).
    n_buffers = 2
    f32_temps = 6
    bytes_per_row = C * _LANES * (
        (pr.dtype.itemsize + gt.dtype.itemsize) * n_buffers + f32_temps * 4)
    r_cap = max(8, (vmem_budget_bytes // bytes_per_row) // 8 * 8)

    if R <= r_cap:
        rt = R                                # single tile: full extent is legal
    else:
        n_tiles = pl.cdiv(R, r_cap)           # balance tiles, keep multiple of 8
        rt = min(r_cap, ((pl.cdiv(R, n_tiles) + 7) // 8) * 8)
    num_s = pl.cdiv(R, rt)

    acc_r = 8 if rt % 8 == 0 else rt          # rows kept in the accumulator
    needs_mask = (num_s * rt * _LANES) != HW  # any padded lanes / extra rows?

    kernel = functools.partial(_iou_sums_kernel, threshold=threshold,
                               hw=HW, rt=rt, acc_r=acc_r,
                               needs_mask=needs_mask)

    in_spec = pl.BlockSpec((None, C, rt, _LANES), lambda n, s: (n, 0, s, 0))
    out_spec = pl.BlockSpec((None, C, acc_r, _LANES), lambda n, s: (n, 0, 0, 0))
    out_sd = jax.ShapeDtypeStruct((N, C, acc_r, _LANES), jnp.float32)

    inter, sgt, spr = pl.pallas_call(
        kernel,
        out_shape=[out_sd, out_sd, out_sd],
        grid_spec=pltpu.PrefetchScalarGridSpec(
            num_scalar_prefetch=0,
            grid=(N, num_s),
            in_specs=[in_spec, in_spec],
            out_specs=[out_spec, out_spec, out_spec],
        ),
        compiler_params=pltpu.CompilerParams(
            dimension_semantics=("parallel", "arbitrary"),
            # Explicit scoped-VMEM limit: covers the real peak (streams +
            # temporaries) even on v5e's 16 MiB default; <= every chip's
            # physical VMEM.
            vmem_limit_bytes=32 * 1024 * 1024,
        ),
    )(pr, gt)

    # Tiny epilogue: reduce lane/sublane/batch partials, apply eps, average
    # classes 1..C-1 exactly like the PyTorch module.
    inter = jnp.sum(inter, axis=(0, 2, 3))    # (C,)
    sgt = jnp.sum(sgt, axis=(0, 2, 3))
    spr = jnp.sum(spr, axis=(0, 2, 3))
    union = sgt + spr - inter + eps
    scores = (inter + eps) / union
    return jnp.mean(scores[1:])


def _reference_iou(input_nchw, target_nchw, threshold=None, eps=1e-7):
    """Pure-JAX reference mirroring the PyTorch module."""
    p = jax.nn.softmax(input_nchw.astype(jnp.float32), axis=1)
    C = input_nchw.shape[1]
    scores = []
    for i in range(1, C):
        ypr = p[:, i]
        if threshold is not None:
            ypr = (ypr > threshold).astype(jnp.float32)
        ygt = target_nchw[:, i].astype(jnp.float32)
        inter = jnp.sum(ygt * ypr)
        union = jnp.sum(ygt) + jnp.sum(ypr) - inter + eps
        scores.append((inter + eps) / union)
    return sum(scores) / len(scores)


if __name__ == "__main__":
    # class_weights exists on the module but is unused in forward(); kept for parity.
    class_weights = jnp.array(1.0, dtype=jnp.float32)  # noqa: F841
    threshold = None

    key = jax.random.PRNGKey(0)
    k1, k2 = jax.random.split(key)

    # Main example: (N, C, H, W) = (2, 4, 16, 16); HW = 256 -> fast no-mask path.
    N, C, H, W = 2, 4, 16, 16
    logits = jax.random.normal(k1, (N, C, H, W), dtype=jnp.float32)
    labels = jax.random.randint(k2, (N, H, W), 0, C)
    target = jnp.transpose(jax.nn.one_hot(labels, C, dtype=jnp.float32),
                           (0, 3, 1, 2))                       # NCHW one-hot

    out = jax.block_until_ready(iou_metric(logits, target, threshold=threshold))
    ref = jax.block_until_ready(_reference_iou(logits, target, threshold=threshold))
    assert jnp.allclose(out, ref, rtol=1e-5, atol=1e-6), (out, ref)

    # Secondary check: ragged spatial size (HW % 128 != 0) exercises the
    # masked last-step path.
    k3, k4 = jax.random.split(k1)
    logits2 = jax.random.normal(k3, (1, 3, 10, 10), dtype=jnp.float32)
    labels2 = jax.random.randint(k4, (1, 10, 10), 0, 3)
    target2 = jnp.transpose(jax.nn.one_hot(labels2, 3, dtype=jnp.float32),
                            (0, 3, 1, 2))
    out2 = jax.block_until_ready(iou_metric(logits2, target2))
    ref2 = jax.block_until_ready(_reference_iou(logits2, target2))
    assert jnp.allclose(out2, ref2, rtol=1e-5, atol=1e-6), (out2, ref2)

    print("KERNEL_OK")
</pallas_src>

<mosaic_0001>
module attributes {stable_mosaic.version = 11 : i64} {
  func.func @_iou_sums_kernel(%arg0: i32, %arg1: i32, %arg2: memref<1x4x2x128xf32, #tpu.memory_space<vmem>>, %arg3: memref<1x4x2x128xf32, #tpu.memory_space<vmem>>, %arg4: memref<1x4x2x128xf32, #tpu.memory_space<vmem>>, %arg5: memref<1x4x2x128xf32, #tpu.memory_space<vmem>>, %arg6: memref<1x4x2x128xf32, #tpu.memory_space<vmem>>) attributes {dimension_semantics = [#tpu.dimension_semantics<parallel>, #tpu.dimension_semantics<arbitrary>], iteration_bounds = array<i64: 2, 1>, scalar_prefetch = 0 : i64, scratch_operands = 0 : i64, tpu.core_type = #tpu.core_type<tc>, window_params = [{transform_indices = @transform_0, window_bounds = array<i64: 1, 4, 2, 128>}, {transform_indices = @transform_1, window_bounds = array<i64: 1, 4, 2, 128>}, {transform_indices = @transform_2, window_bounds = array<i64: 1, 4, 2, 128>}, {transform_indices = @transform_3, window_bounds = array<i64: 1, 4, 2, 128>}, {transform_indices = @transform_4, window_bounds = array<i64: 1, 4, 2, 128>}]} {
    %c0_i32 = arith.constant 0 : i32
    %0 = arith.cmpi eq, %arg1, %c0_i32 : i32
    %1 = arith.extui %0 : i1 to i32
    %c0_i32_0 = arith.constant 0 : i32
    %2 = arith.cmpi ne, %1, %c0_i32_0 : i32
    scf.if %2 {
      %cst_33 = arith.constant 0.000000e+00 : f32
      %36 = vector.broadcast %cst_33 : f32 to vector<4x2x128xf32>
      %c0_34 = arith.constant 0 : index
      %c0_35 = arith.constant 0 : index
      %c0_36 = arith.constant 0 : index
      %c0_37 = arith.constant 0 : index
      %37 = vector.load %arg4[%c0_34, %c0_35, %c0_36, %c0_37] : memref<1x4x2x128xf32, #tpu.memory_space<vmem>>, vector<1x4x2x128xf32>
      %38 = vector.shape_cast %37 : vector<1x4x2x128xf32> to vector<4x2x128xf32>
      %39 = vector.shape_cast %36 : vector<4x2x128xf32> to vector<1x4x2x128xf32>
      tpu.vector_store %arg4[%c0_34, %c0_35, %c0_36, %c0_37], %39 {strides = array<i32>} : memref<1x4x2x128xf32, #tpu.memory_space<vmem>>, vector<1x4x2x128xf32>,
      %cst_38 = arith.constant 0.000000e+00 : f32
      %40 = vector.broadcast %cst_38 : f32 to vector<4x2x128xf32>
      %c0_39 = arith.constant 0 : index
      %c0_40 = arith.constant 0 : index
      %c0_41 = arith.constant 0 : index
      %c0_42 = arith.constant 0 : index
      %41 = vector.load %arg5[%c0_39, %c0_40, %c0_41, %c0_42] : memref<1x4x2x128xf32, #tpu.memory_space<vmem>>, vector<1x4x2x128xf32>
      %42 = vector.shape_cast %41 : vector<1x4x2x128xf32> to vector<4x2x128xf32>
      %43 = vector.shape_cast %40 : vector<4x2x128xf32> to vector<1x4x2x128xf32>
      tpu.vector_store %arg5[%c0_39, %c0_40, %c0_41, %c0_42], %43 {strides = array<i32>} : memref<1x4x2x128xf32, #tpu.memory_space<vmem>>, vector<1x4x2x128xf32>,
      %cst_43 = arith.constant 0.000000e+00 : f32
      %44 = vector.broadcast %cst_43 : f32 to vector<4x2x128xf32>
      %c0_44 = arith.constant 0 : index
      %c0_45 = arith.constant 0 : index
      %c0_46 = arith.constant 0 : index
      %c0_47 = arith.constant 0 : index
      %45 = vector.load %arg6[%c0_44, %c0_45, %c0_46, %c0_47] : memref<1x4x2x128xf32, #tpu.memory_space<vmem>>, vector<1x4x2x128xf32>
      %46 = vector.shape_cast %45 : vector<1x4x2x128xf32> to vector<4x2x128xf32>
      %47 = vector.shape_cast %44 : vector<4x2x128xf32> to vector<1x4x2x128xf32>
      tpu.vector_store %arg6[%c0_44, %c0_45, %c0_46, %c0_47], %47 {strides = array<i32>} : memref<1x4x2x128xf32, #tpu.memory_space<vmem>>, vector<1x4x2x128xf32>,
    } else {
    }
    %c0 = arith.constant 0 : index
    %c0_1 = arith.constant 0 : index
    %c0_2 = arith.constant 0 : index
    %c0_3 = arith.constant 0 : index
    %3 = vector.load %arg2[%c0, %c0_1, %c0_2, %c0_3] : memref<1x4x2x128xf32, #tpu.memory_space<vmem>>, vector<1x4x2x128xf32>
    %4 = vector.shape_cast %3 : vector<1x4x2x128xf32> to vector<4x2x128xf32>
    %c0_4 = arith.constant 0 : index
    %c0_5 = arith.constant 0 : index
    %c0_6 = arith.constant 0 : index
    %c0_7 = arith.constant 0 : index
    %5 = vector.load %arg3[%c0_4, %c0_5, %c0_6, %c0_7] : memref<1x4x2x128xf32, #tpu.memory_space<vmem>>, vector<1x4x2x128xf32>
    %6 = vector.shape_cast %5 : vector<1x4x2x128xf32> to vector<4x2x128xf32>
    %cst = arith.constant dense<0xFF800000> : vector<2x128xf32>
    %7 = vector.multi_reduction <maximumf>, %4, %cst [0] : vector<4x2x128xf32> to vector<2x128xf32>
    %8 = vector.shape_cast %7 : vector<2x128xf32> to vector<1x2x128xf32>
    %9 = vector.broadcast %8 : vector<1x2x128xf32> to vector<4x2x128xf32>
    %10 = arith.subf %4, %9 : vector<4x2x128xf32>
    %11 = math.exp %10 : vector<4x2x128xf32>
    %cst_8 = arith.constant dense<0.000000e+00> : vector<2x128xf32>
    %12 = vector.multi_reduction <add>, %11, %cst_8 [0] : vector<4x2x128xf32> to vector<2x128xf32>
    %13 = vector.shape_cast %12 : vector<2x128xf32> to vector<1x2x128xf32>
    %14 = tpu.reciprocal %13 : vector<1x2x128xf32> -> vector<1x2x128xf32>
    %15 = vector.broadcast %14 : vector<1x2x128xf32> to vector<4x2x128xf32>
    %16 = arith.mulf %11, %15 : vector<4x2x128xf32>
    %c0_9 = arith.constant 0 : index
    %c0_10 = arith.constant 0 : index
    %c0_11 = arith.constant 0 : index
    %c0_12 = arith.constant 0 : index
    %17 = vector.load %arg4[%c0_9, %c0_10, %c0_11, %c0_12] : memref<1x4x2x128xf32, #tpu.memory_space<vmem>>, vector<1x4x2x128xf32>
    %18 = vector.shape_cast %17 : vector<1x4x2x128xf32> to vector<4x2x128xf32>
    %19 = arith.mulf %6, %16 : vector<4x2x128xf32>
    %20 = arith.addf %18, %19 : vector<4x2x128xf32>
    %c0_13 = arith.constant 0 : index
    %c0_14 = arith.constant 0 : index
    %c0_15 = arith.constant 0 : index
    %c0_16 = arith.constant 0 : index
    %21 = vector.load %arg4[%c0_13, %c0_14, %c0_15, %c0_16] : memref<1x4x2x128xf32, #tpu.memory_space<vmem>>, vector<1x4x2x128xf32>
    %22 = vector.shape_cast %21 : vector<1x4x2x128xf32> to vector<4x2x128xf32>
    %23 = vector.shape_cast %20 : vector<4x2x128xf32> to vector<1x4x2x128xf32>
    tpu.vector_store %arg4[%c0_13, %c0_14, %c0_15, %c0_16], %23 {strides = array<i32>} : memref<1x4x2x128xf32, #tpu.memory_space<vmem>>, vector<1x4x2x128xf32>,
    %c0_17 = arith.constant 0 : index
    %c0_18 = arith.constant 0 : index
    %c0_19 = arith.constant 0 : index
    %c0_20 = arith.constant 0 : index
    %24 = vector.load %arg5[%c0_17, %c0_18, %c0_19, %c0_20] : memref<1x4x2x128xf32, #tpu.memory_space<vmem>>, vector<1x4x2x128xf32>
    %25 = vector.shape_cast %24 : vector<1x4x2x128xf32> to vector<4x2x128xf32>
    %26 = arith.addf %25, %6 : vector<4x2x128xf32>
    %c0_21 = arith.constant 0 : index
    %c0_22 = arith.constant 0 : index
    %c0_23 = arith.constant 0 : index
    %c0_24 = arith.constant 0 : index
    %27 = vector.load %arg5[%c0_21, %c0_22, %c0_23, %c0_24] : memref<1x4x2x128xf32, #tpu.memory_space<vmem>>, vector<1x4x2x128xf32>
    %28 = vector.shape_cast %27 : vector<1x4x2x128xf32> to vector<4x2x128xf32>
    %29 = vector.shape_cast %26 : vector<4x2x128xf32> to vector<1x4x2x128xf32>
    tpu.vector_store %arg5[%c0_21, %c0_22, %c0_23, %c0_24], %29 {strides = array<i32>} : memref<1x4x2x128xf32, #tpu.memory_space<vmem>>, vector<1x4x2x128xf32>,
    %c0_25 = arith.constant 0 : index
    %c0_26 = arith.constant 0 : index
    %c0_27 = arith.constant 0 : index
    %c0_28 = arith.constant 0 : index
    %30 = vector.load %arg6[%c0_25, %c0_26, %c0_27, %c0_28] : memref<1x4x2x128xf32, #tpu.memory_space<vmem>>, vector<1x4x2x128xf32>
    %31 = vector.shape_cast %30 : vector<1x4x2x128xf32> to vector<4x2x128xf32>
    %32 = arith.addf %31, %16 : vector<4x2x128xf32>
    %c0_29 = arith.constant 0 : index
    %c0_30 = arith.constant 0 : index
    %c0_31 = arith.constant 0 : index
    %c0_32 = arith.constant 0 : index
    %33 = vector.load %arg6[%c0_29, %c0_30, %c0_31, %c0_32] : memref<1x4x2x128xf32, #tpu.memory_space<vmem>>, vector<1x4x2x128xf32>
    %34 = vector.shape_cast %33 : vector<1x4x2x128xf32> to vector<4x2x128xf32>
    %35 = vector.shape_cast %32 : vector<4x2x128xf32> to vector<1x4x2x128xf32>
    tpu.vector_store %arg6[%c0_29, %c0_30, %c0_31, %c0_32], %35 {strides = array<i32>} : memref<1x4x2x128xf32, #tpu.memory_space<vmem>>, vector<1x4x2x128xf32>,
    return
  }
  func.func @transform_0(%arg0: i32, %arg1: i32) -> (i32, i32, i32, i32) {
    %c0_i32 = arith.constant 0 : i32
    %c0_i32_0 = arith.constant 0 : i32
    %c0_i32_1 = arith.constant 0 : i32
    return %arg0, %c0_i32, %arg1, %c0_i32_0 : i32, i32, i32, i32
  }
  func.func @transform_1(%arg0: i32, %arg1: i32) -> (i32, i32, i32, i32) {
    %c0_i32 = arith.constant 0 : i32
    %c0_i32_0 = arith.constant 0 : i32
    %c0_i32_1 = arith.constant 0 : i32
    return %arg0, %c0_i32, %arg1, %c0_i32_0 : i32, i32, i32, i32
  }
  func.func @transform_2(%arg0: i32, %arg1: i32) -> (i32, i32, i32, i32) {
    %c0_i32 = arith.constant 0 : i32
    %c0_i32_0 = arith.constant 0 : i32
    %c0_i32_1 = arith.constant 0 : i32
    %c0_i32_2 = arith.constant 0 : i32
    return %arg0, %c0_i32, %c0_i32_0, %c0_i32_1 : i32, i32, i32, i32
  }
  func.func @transform_3(%arg0: i32, %arg1: i32) -> (i32, i32, i32, i32) {
    %c0_i32 = arith.constant 0 : i32
    %c0_i32_0 = arith.constant 0 : i32
    %c0_i32_1 = arith.constant 0 : i32
    %c0_i32_2 = arith.constant 0 : i32
    return %arg0, %c0_i32, %c0_i32_0, %c0_i32_1 : i32, i32, i32, i32
  }
  func.func @transform_4(%arg0: i32, %arg1: i32) -> (i32, i32, i32, i32) {
    %c0_i32 = arith.constant 0 : i32
    %c0_i32_0 = arith.constant 0 : i32
    %c0_i32_1 = arith.constant 0 : i32
    %c0_i32_2 = arith.constant 0 : i32
    return %arg0, %c0_i32, %c0_i32_0, %c0_i32_1 : i32, i32, i32, i32
  }
}

</mosaic_0001>

<bundles_post_ra>
// kernel: tpu_custom_call.1
= control target key start
LH: loop header
LB: loop body
LE: loop exit
PB: predicated region body
PF: predicated region fallthrough
CT: control target
= control target key end

     0   :  { %s1382_s0 = inlined_call_operand.hbm [shape: f32[2,4,2,128], index: 0, kind: input, shape index: {}]   ;;  %s1383_s1 = inlined_call_operand.hbm [shape: f32[2,4,2,128], index: 1, kind: input, shape index: {}]   ;;  %s1384_s2 = inlined_call_operand.hbm [shape: f32[2,4,2,128], index: 2, kind: output, shape index: {0}]   ;;  %s1385_s3 = inlined_call_operand.hbm [shape: f32[2,4,2,128], index: 3, kind: output, shape index: {1}]   ;;  %s1386_s4 = inlined_call_operand.hbm [shape: f32[2,4,2,128], index: 4, kind: output, shape index: {2}]  }
   0x1   :  { %1391 = sst [smem:[#allocation15_spill]] %s1382_s0 }
   0x2   :  { %10 = vsyncpa [#allocation3], 0 }
   0x3   :  { %12 = vsyncpa [#allocation3 + $0x1], 0 }
   0x4   :  { %13 = vsyncpa [#allocation6], 0 }
   0x5   :  { %15 = vsyncpa [#allocation6 + $0x1], 0 }
   0x6   :  { %16 = vsyncpa [#allocation4], 0 }
   0x7   :  { %18 = vsyncpa [#allocation4 + $0x1], 0 }
   0x8   :  { %19 = vsyncpa [#allocation9], 0 }
   0x9   :  { %21 = vsyncpa [#allocation9 + $0x1], 0  ;;  %s980_s15 = smov 0   ;;  %s982_s16 = smov 0  }
   0xa   :  { %s984_s17 = smov 0   ;;  %s986_s18 = smov 0  }
   0xb   :  { %s988_s19 = smov 0   ;;  %s990_s20 = smov 0  }
   0xc LB: > { %s1011_s21 = sadd.s32 4294967295, %s943_s20   ;;  %s1387_s22 = sadd.s32 4294967294, %s943_s20   ;;  %s943_s20 = sphi %s990_s20, %s27_s20   ;;  %s939_s19 = sphi %s988_s19, %s1410_s19   ;;  %s935_s18 = sphi %s986_s18, %s1409_s18   ;;  %s931_s17 = sphi %s984_s17, %s1408_s17   ;;  %s927_s16 = sphi %s982_s16, %s1407_s16   ;;  %s923_s15 = sphi %s980_s15, %s1406_s15  }
   0xd   : > { %s39_s23 = sadd.s32 1, %s939_s19  ;;  %s48_s24 = sadd.s32 1, %s931_s17 }
   0xe   : > { %p41_p0 = scmp.ge.s32.totalorder %s39_s23, 2  ;;  %p55_p1 = scmp.ne.s32.totalorder %s931_s17, %s927_s16 }
   0xf   : > { %p56_p2 = scmp.eq.s32.totalorder %s943_s20, 0  ;;  %p61_p3 = scmp.ne.s32.totalorder %s927_s16, %s923_s15 }
  0x10   : > { %s1412_s23 = smov (%p41_p0, %s39_s23), 0  ;;  %p62_p5 = scmp.eq.s32.totalorder %s1011_s21, 0 }
  0x11   : > { %p1023_p4 = por %p56_p2, %p55_p1  ;;  %s43_s26 = ssub.s32 %s939_s19, %s1412_s23 }
  0x12   : > { %p113_p6 = scmp.eq.s32.totalorder %s1011_s21, 1  ;;  %p46_p7 = scmp.eq.s32.totalorder %s43_s26, 0 }
  0x13   : > { %p1031_p8 = por %p62_p5, %p61_p3  ;;  %p119_p10 = scmp.eq.s32.totalorder %s1387_s22, 1 }
  0x14   : > { %p1035_p9 = por %p113_p6, %p55_p1  ;;  %p672_p13 = scmp.lt.s32.totalorder %s943_s20, 2 }
  0x15   : > { %s1393_s27 = scalar_select %p1031_p8, 1, 0 }
  0x16   : > { %s1394_s28 = scalar_select %p1035_p9, 1, 0 }
  0x17   : > { %s1042_s29 = scalar_select %p46_p7, %s931_s17, %s48_s24  }
  0x18   : > { %p1044_p11 = por %p119_p10, %p61_p3  ;;  %s1051_s5 = sand.u32 1, %s931_s17  }
  0x19   : > { %s617_s6 = sshll.u32 %s1051_s5, 3  ;;  %s640_s7 = sshll.u32 %s939_s19, 7 }
  0x1a   : > { %s1395_s30 = scalar_select %p1044_p11, 1, 0 }
  0x1b   : > { %s1396_s0 = sld [smem:[#allocation15_spill]]  ;;  %s195_s11 = scalar_lea.vmem [#allocation2], %s617_s6 }
  0x1c   : > { %s203_s12 = sshll.u32 %s195_s11, 4  ;;  %p1068_p0 = pnand %p672_p13, %p1023_p4  ;;  %s1064_s12 = int_to_ptr.vmem [resolvable:$true] %s203_s12 }
  0x1d   : > { %s192_s14 = scalar_lea.sflag [#allocation3], %s1051_s5 }
  0x1e   : > { %p739_p3 = pneg %p1068_p0 }
  0x21   : > { %s1060_s10 = scalar_lea.hbm %s1396_s0, %s640_s7  ;;  %s742_s25 = scalar_lea.hbm %s1396_s0, 256 }
  0x22   : > { %s737_s24 = scalar_lea.hbm %s1060_s10, 128  ;;  %p743_p4 = scmp.lt.u32.totalorder %s1060_s10, %s1396_s0 }
  0x23   : > { %p738_p2 = scmp.ne.s32.totalorder %s1060_s10, %s737_s24  ;;  %p744_p7 = scmp.lt.u32.totalorder %s742_s25, %s737_s24 }
  0x24   : > { %p746_p13 = scmp.lt.u32.totalorder %s737_s24, %s1060_s10 }
  0x25   : > { %p740_p5 = pnand %p739_p3, %p738_p2  ;;  %p745_p10 = por %p744_p7, %p743_p4 }
  0x27   : > { %p741_p6 = pneg %p740_p5  ;;  %p747_p12 = por %p746_p13, %p745_p10 }
  0x29   : > { %p748_p1 = pnand %p747_p12, %p741_p6 }
  0x2b   : > { %751 = shalt.err (!%p748_p1)
}
  0x2c   : > { %s752_s22 = scalar_lea.vmem %s1064_s12, 128  ;;  %s945_s26 = smov [#allocation2]  }
  0x2d   : > { %p753_p2 = scmp.ne.s32.totalorder %s1064_s12, %s752_s22  ;;  %s757_s8 = sshll.u32 %s945_s26, 4  ;;  %s758_s8 = int_to_ptr.vmem [resolvable:$false] %s757_s8 }
  0x2e   : > { %s759_s9 = scalar_lea.vmem %s758_s8, 256  ;;  %p760_p9 = scmp.lt.s32.totalorder %s1064_s12, %s758_s8 }
  0x2f   : > { %p755_p5 = pnand %p753_p2, %p739_p3  ;;  %p761_p4 = scmp.lt.s32.totalorder %s759_s9, %s752_s22 }
  0x31   : > { %p756_p11 = pneg %p755_p5  ;;  %p762_p7 = por %p761_p4, %p760_p9 }
  0x33   : > { %p763_p10 = pnand %p762_p7, %p756_p11 }
  0x35   : > { %766 = shalt.err (!%p763_p10)
}
  0x36   : > { %s1389_s24 = smov 32   ;;  %s947_s25 = smov 2  }
  0x37   : > { %658 = dma.hbm_to_vmem [thread:$0]  (!%p1068_p0), %s1060_s10, 128, %s1064_s12, %s192_s14, %s1389_s24, %s1389_s24, %s947_s25  }
  0x38   : > { %p233_p9 = scmp.lt.s32.totalorder %s943_s20, 3  ;;  %s1110_s26 = scalar_lea.hbm %s1383_s1, %s640_s7 }
  0x39   : > { %p1398_p11 = scmp.ge.s32.totalorder %s943_s20, 1  ;;  %s217_s9 = scalar_lea.vmem [#allocation5], %s617_s6 }
  0x3a   : > { %s225_s0 = sshll.u32 %s217_s9, 4  ;;  %s214_s10 = scalar_lea.sflag [#allocation6], %s1051_s5  ;;  %s1120_s0 = int_to_ptr.vmem [resolvable:$true] %s225_s0 }
  0x3b   : > { %p1114_p12 = pnand %p1398_p11, %p233_p9  ;;  %s767_s12 = scalar_lea.hbm %s1110_s26, 128 }
  0x3c   : > { %p768_p1 = scmp.ne.s32.totalorder %s1110_s26, %s767_s12  ;;  %s772_s22 = scalar_lea.hbm %s1383_s1, 256 }
  0x3d   : > { %p773_p2 = scmp.lt.u32.totalorder %s1110_s26, %s1383_s1  ;;  %p774_p5 = scmp.lt.u32.totalorder %s772_s22, %s767_s12 }
  0x3e   : > { %p770_p6 = pnand %p768_p1, %p739_p3  ;;  %p776_p7 = scmp.lt.u32.totalorder %s767_s12, %s1110_s26 }
  0x3f   : > { %p775_p4 = por %p774_p5, %p773_p2 }
  0x40   : > { %p771_p13 = pneg %p770_p6 }
  0x41   : > { %p777_p10 = por %p776_p7, %p775_p4 }
  0x43   : > { %p778_p9 = pnand %p777_p10, %p771_p13 }
  0x45   : > { %781 = shalt.err (!%p778_p9)
}
  0x46   : > { %s782_s6 = scalar_lea.vmem %s1120_s0, 128  ;;  %s948_s9 = smov [#allocation5]  }
  0x47   : > { %p783_p11 = scmp.ne.s32.totalorder %s1120_s0, %s782_s6  ;;  %s787_s7 = sshll.u32 %s948_s9, 4  ;;  %s788_s7 = int_to_ptr.vmem [resolvable:$false] %s787_s7 }
  0x48   : > { %s789_s24 = scalar_lea.vmem %s788_s7, 256  ;;  %p790_p8 = scmp.lt.s32.totalorder %s1120_s0, %s788_s7 }
  0x49   : > { %p785_p1 = pnand %p783_p11, %p739_p3  ;;  %p791_p2 = scmp.lt.s32.totalorder %s789_s24, %s782_s6 }
  0x4b   : > { %p786_p6 = pneg %p785_p1  ;;  %p792_p5 = por %p791_p2, %p790_p8 }
  0x4d   : > { %p793_p4 = pnand %p792_p5, %p786_p6 }
  0x4f   : > { %796 = shalt.err (!%p793_p4)
}
  0x50   : > { %s1400_s12 = smov 32   ;;  %237 = sbr.rel (%p1114_p12) target bundleno = 200 (0xc8), region = 28 }
  0x51   : > { %661 = dma.hbm_to_vmem [thread:$0]  (!%p1068_p0), %s1110_s26, 128, %s1120_s0, %s214_s10, %s1400_s12, %s1400_s12, %s947_s25  }
  0x52   : > { %s1154_s14 = sand.u32 (!%p1114_p12), 1, %s927_s16   ;;  %p1401_p8 = scmp.ne.s32.totalorder (!%p1114_p12), %s1393_s27, 0 }
  0x53   : > { %s624_s22 = sshll.u32 (!%p1114_p12), %s1154_s14, 3  ;;  %s240_s11 = scalar_lea.sflag (!%p1114_p12), [#allocation3], %s1154_s14 }
  0x54   : > { %s1158_s13 = scalar_lea.vmem (!%p1114_p12), [#allocation2], %s624_s22 }
  0x57   : > { %906 = dma.done.wait (%p1401_p8), %s240_s11, 128  }
  0x58   : > { %908 = vsyncadd (%p1401_p8), %s240_s11, 4294967168  ;;  %s249_s0 = scalar_lea.sflag [#allocation6], %s1154_s14  ;;  %s1165_s5 = scalar_lea.vmem [#allocation5], %s624_s22 }
  0x59   : > { %910 = dma.done.wait (%p1401_p8), %s249_s0, 128  }
  0x5a   : > { %912 = vsyncadd (%p1401_p8), %s249_s0, 4294967168  ;;  %s1171_s25 = scalar_lea.vmem [#allocation8], %s624_s22  ;;  %v949_v0 = vmov 0.0   ;;  %s1177_s26 = scalar_lea.vmem [#allocation7], %s624_s22  ;;  %vm316_vm0 = vcmask 1041408  }
  0x5b   : > { %300 = vst [vmem:[%s1171_s25] sm:$0x3] %v949_v0  ;;  %301 = vst [vmem:[%s1171_s25 + $0x2] sm:$0x3] %v949_v0  ;;  %s1183_s27 = scalar_lea.vmem [#allocation10], %s624_s22  ;;  %s393_s8 = sand.u32 1, %s1011_s21  }
  0x5c   : > { %302 = vst [vmem:[%s1171_s25 + $0x4] sm:$0x3] %v949_v0  ;;  %303 = vst [vmem:[%s1171_s25 + $0x6] sm:$0x3] %v949_v0  ;;  %s1191_s10 = sshll.u32 %s935_s18, 7  ;;  %s428_s6 = sshll.u32 %s1171_s25, 4  ;;  %s1232_s6 = int_to_ptr.vmem [resolvable:$true] %s428_s6 }
  0x5d   : > { %296 = vst [vmem:[%s1177_s26] sm:$0x3] %v949_v0  ;;  %297 = vst [vmem:[%s1177_s26 + $0x2] sm:$0x3] %v949_v0  ;;  %v1195_v1 = vld [vmem:[%s1165_s5] sm:$0x3]  ;;  %s1230_s7 = scalar_lea.hbm %s1385_s3, %s1191_s10  ;;  %s1236_s24 = scalar_lea.sflag [#allocation9], %s393_s8 }
  0x5e   : > { %298 = vst [vmem:[%s1177_s26 + $0x4] sm:$0x3] %v949_v0  ;;  %299 = vst [vmem:[%s1177_s26 + $0x6] sm:$0x3] %v949_v0  ;;  %v1198_v2 = vld [vmem:[%s1165_s5 + $0x2] sm:$0x3] }
  0x5f   : > { %304 = vst [vmem:[%s1183_s27] sm:$0x3] %v949_v0  ;;  %305 = vst [vmem:[%s1183_s27 + $0x2] sm:$0x3] %v949_v0  ;;  %v1201_v3 = vld [vmem:[%s1165_s5 + $0x4] sm:$0x3]  ;;  %s797_s12 = scalar_lea.vmem %s1232_s6, 128 }
  0x60   : > { %306 = vst [vmem:[%s1183_s27 + $0x4] sm:$0x3] %v949_v0  ;;  %307 = vst [vmem:[%s1183_s27 + $0x6] sm:$0x3] %v949_v0  ;;  %v1210_v10 = vld [vmem:[%s1165_s5 + $0x6] sm:$0x3]  ;;  %p798_p0 = scmp.ne.s32.totalorder %s1232_s6, %s797_s12 }
  0x61   : > { %v308_v12 = vld [vmem:[%s1158_s13] sm:$0x3]  ;;  %v309_v14 = vld [vmem:[%s1158_s13 + $0x2] sm:$0x3]  ;;  %v310_v15 = vld [vmem:[%s1158_s13 + $0x4] sm:$0x3] }
  0x62   : > { %v364_v4 = vld [vmem:[%s1171_s25] sm:$0x3]  ;;  %v365_v5 = vld [vmem:[%s1171_s25 + $0x2] sm:$0x3]  ;;  %v311_v16 = vld [vmem:[%s1158_s13 + $0x6] sm:$0x3] }
  0x63   : > { %v366_v6 = vld [vmem:[%s1171_s25 + $0x4] sm:$0x3]  ;;  %v368_v7 = vadd.f32 %v364_v4, %v1195_v1  ;;  %v369_v8 = vadd.f32 %v365_v5, %v1198_v2  ;;  %v367_v11 = vld [vmem:[%s1171_s25 + $0x6] sm:$0x3]  ;;  %v317_v17 = vsel %vm316_vm0, %v308_v12, -inf  ;;  %v318_v18 = vsel %vm316_vm0, %v309_v14, -inf }
  0x64   : > { %v370_v9 = vadd.f32 %v366_v6, %v1201_v3  ;;  %v371_v13 = vadd.f32 %v367_v11, %v1210_v10  ;;  %v319_v19 = vsel %vm316_vm0, %v310_v15, -inf  ;;  %v320_v20 = vsel %vm316_vm0, %v311_v16, -inf  ;;  %p1402_p3 = scmp.ne.s32.totalorder %s1394_s28, 0  ;;  %s950_s22 = smov [#allocation8]  }
  0x65   : > { %372 = vst [vmem:[%s1171_s25] sm:$0x3] %v368_v7  ;;  %373 = vst [vmem:[%s1171_s25 + $0x2] sm:$0x3] %v369_v8  ;;  %v321_v21 = vmax.f32 %v317_v17, %v318_v18  ;;  %v322_v22 = vmax.f32 %v319_v19, %v320_v20  ;;  %s801_s11 = sshll.u32 %s950_s22, 4  ;;  %s802_s11 = int_to_ptr.vmem [resolvable:$false] %s801_s11 }
  0x66   : > { %374 = vst [vmem:[%s1171_s25 + $0x4] sm:$0x3] %v370_v9  ;;  %375 = vst [vmem:[%s1171_s25 + $0x6] sm:$0x3] %v371_v13  ;;  %p799_p12 = pnand %p798_p0, %p1402_p3  ;;  %s803_s13 = scalar_lea.vmem %s802_s11, 256 }
  0x67   : > { %v323_v23 = vmax.f32 %v321_v21, %v322_v22  ;;  %p804_p7 = scmp.lt.s32.totalorder %s1232_s6, %s802_s11  ;;  %p805_p10 = scmp.lt.s32.totalorder %s803_s13, %s797_s12 }
  0x68   : > { %p800_p13 = pneg %p799_p12 }
  0x69   : > { %p806_p9 = por %p805_p10, %p804_p7 }
  0x6b   : > { %p807_p11 = pnand %p806_p9, %p800_p13 }
  0x6d   : > { %810 = shalt.err (!%p807_p11)
}
  0x6e   : > { %s811_s21 = scalar_lea.hbm %s1230_s7, 128  ;;  %s815_s25 = scalar_lea.hbm %s1385_s3, 256 }
  0x6f   : > { %p812_p1 = scmp.ne.s32.totalorder %s1230_s7, %s811_s21  ;;  %p816_p5 = scmp.lt.u32.totalorder %s1230_s7, %s1385_s3 }
  0x70   : > { %p817_p4 = scmp.lt.u32.totalorder %s815_s25, %s811_s21  ;;  %p819_p0 = scmp.lt.u32.totalorder %s811_s21, %s1230_s7 }
  0x71   : > { %p813_p6 = pnand %p812_p1, %p1402_p3 }
  0x72   : > { %p818_p8 = por %p817_p4, %p816_p5 }
  0x73   : > { %p814_p2 = pneg %p813_p6 }
  0x74   : > { %p820_p12 = por %p819_p0, %p818_p8 }
  0x76   : > { %p821_p13 = pnand %p820_p12, %p814_p2 }
  0x78   : > { %824 = shalt.err (!%p821_p13)
}
  0x79   : > { %s951_s9 = smov 32   ;;  %s952_s12 = smov 2   ;;  %v324_v24 = vsub.f32 %v308_v12, %v323_v23  ;;  %v325_v25 = vsub.f32 %v309_v14, %v323_v23  ;;  %v326_v26 = vsub.f32 %v310_v15, %v323_v23  ;;  %v327_v27 = vsub.f32 %v311_v16, %v323_v23  ;;  %v348_v44 = vld [vmem:[%s1177_s26] sm:$0x3]  ;;  %v349_v45 = vld [vmem:[%s1177_s26 + $0x2] sm:$0x3] }
  0x7a   : > { %650 = dma.vmem_to_hbm [thread:$0]  (%p1402_p3), %s1232_s6, 128, %s1230_s7, %s1236_s24, %s951_s9, %s951_s9, %s952_s12  }
  0x7b   : > { %v328_v28 = vmul.f32 1.442695, %v324_v24  ;;  %v330_v29 = vmul.f32 1.442695, %v325_v25  ;;  %v332_v30 = vmul.f32 1.442695, %v326_v26  ;;  %s1285_s13 = scalar_lea.hbm %s1386_s4, %s1191_s10  ;;  %s1293_s5 = scalar_lea.hbm %s1384_s2, %s1191_s10 }
  0x7c   : > { %v334_v31 = vmul.f32 1.442695, %v327_v27  ;;  %v376_v46 = vld [vmem:[%s1183_s27] sm:$0x3]  ;;  %v377_v47 = vld [vmem:[%s1183_s27 + $0x2] sm:$0x3] }
  0x7d   : > { %727 = vpow2.f32 %v328_v28  ;;  %v378_v52 = vld [vmem:[%s1183_s27 + $0x4] sm:$0x3]  ;;  %v379_v53 = vld [vmem:[%s1183_s27 + $0x6] sm:$0x3]  ;;  %s444_s6 = sshll.u32 %s1183_s27, 4  ;;  %s412_s7 = sshll.u32 %s1177_s26, 4  ;;  %s1287_s6 = int_to_ptr.vmem [resolvable:$true] %s444_s6  ;;  %s1295_s7 = int_to_ptr.vmem [resolvable:$true] %s412_s7 }
  0x7e   : > { %729 = vpow2.f32 %v330_v29  ;;  %v350_v54 = vld [vmem:[%s1177_s26 + $0x4] sm:$0x3]  ;;  %v351_v55 = vld [vmem:[%s1177_s26 + $0x6] sm:$0x3]  ;;  %s825_s25 = scalar_lea.vmem %s1287_s6, 128  ;;  %s953_s8 = smov [#allocation10]  }
  0x7f   : > { %731 = vpow2.f32 %v332_v30  ;;  %p826_p7 = scmp.ne.s32.totalorder %s1287_s6, %s825_s25  ;;  %s829_s18 = sshll.u32 %s953_s8, 4  ;;  %s830_s18 = int_to_ptr.vmem [resolvable:$false] %s829_s18 }
  0x80   : > { %733 = vpow2.f32 %v334_v31  ;;  %s831_s10 = scalar_lea.vmem %s830_s18, 256  ;;  %p832_p11 = scmp.lt.s32.totalorder %s1287_s6, %s830_s18 }
  0x81   : > { %p827_p10 = pnand %p826_p7, %p1402_p3  ;;  %p833_p1 = scmp.lt.s32.totalorder %s831_s10, %s825_s25 }
  0x83   : > { %p828_p9 = pneg %p827_p10  ;;  %p834_p6 = por %p833_p1, %p832_p11 }
  0x85   : > { %p835_p2 = pnand %p834_p6, %p828_p9 }
  0x87   : > { %v728_v32 = vpop.eup %727 }
  0x88   : > { %v730_v33 = vpop.eup %729  ;;  %v336_v34 = vsel %vm316_vm0, %v728_v32, 0.0 }
  0x89   : > { %v732_v35 = vpop.eup %731  ;;  %v337_v36 = vsel %vm316_vm0, %v730_v33, 0.0 }
  0x8a   : > { %v734_v37 = vpop.eup %733  ;;  %v338_v38 = vadd.f32 %v337_v36, %v336_v34  ;;  %v339_v39 = vsel %vm316_vm0, %v732_v35, 0.0 }
  0x8b   : > { %v341_v40 = vsel %vm316_vm0, %v734_v37, 0.0 }
  0x8c   : > { %v340_v41 = vadd.f32 %v339_v39, %v338_v38 }
  0x8e   : > { %v342_v42 = vadd.f32 %v341_v40, %v340_v41 }
  0x90   : > { %735 = vrcp.f32 %v342_v42 }
  0x9a   : > { %v736_v43 = vpop.eup %735 }
  0x9b   : > { %v344_v48 = vmul.f32 %v736_v43, %v728_v32  ;;  %v345_v49 = vmul.f32 %v736_v43, %v730_v33  ;;  %v346_v50 = vmul.f32 %v736_v43, %v732_v35  ;;  %v347_v51 = vmul.f32 %v736_v43, %v734_v37 }
  0x9d   : > { %v352_v56 = vmul.f32 %v344_v48, %v1195_v1  ;;  %v353_v57 = vmul.f32 %v345_v49, %v1198_v2  ;;  %v354_v58 = vmul.f32 %v346_v50, %v1201_v3  ;;  %v355_v59 = vmul.f32 %v347_v51, %v1210_v10 }
  0x9e   : > { %v380_v60 = vadd.f32 %v376_v46, %v344_v48  ;;  %v381_v61 = vadd.f32 %v377_v47, %v345_v49  ;;  %v382_v62 = vadd.f32 %v378_v52, %v346_v50  ;;  %v383_v63 = vadd.f32 %v379_v53, %v347_v51 }
  0x9f   : > { %v356_v0 = vadd.f32 %v352_v56, %v348_v44  ;;  %v357_v1 = vadd.f32 %v353_v57, %v349_v45  ;;  %v358_v2 = vadd.f32 %v354_v58, %v350_v54  ;;  %v359_v3 = vadd.f32 %v355_v59, %v351_v55 }
  0xa0   : > { %384 = vst [vmem:[%s1183_s27] sm:$0x3] %v380_v60  ;;  %385 = vst [vmem:[%s1183_s27 + $0x2] sm:$0x3] %v381_v61 }
  0xa1   : > { %386 = vst [vmem:[%s1183_s27 + $0x4] sm:$0x3] %v382_v62  ;;  %387 = vst [vmem:[%s1183_s27 + $0x6] sm:$0x3] %v383_v63 }
  0xa2   : > { %360 = vst [vmem:[%s1177_s26] sm:$0x3] %v356_v0  ;;  %361 = vst [vmem:[%s1177_s26 + $0x2] sm:$0x3] %v357_v1 }
  0xa3   : > { %362 = vst [vmem:[%s1177_s26 + $0x4] sm:$0x3] %v358_v2  ;;  %363 = vst [vmem:[%s1177_s26 + $0x6] sm:$0x3] %v359_v3 }
  0xa4   : > { %838 = shalt.err (!%p835_p2)
}
  0xa5   : > { %s839_s26 = scalar_lea.hbm %s1285_s13, 128  ;;  %s843_s11 = scalar_lea.hbm %s1386_s4, 256 }
  0xa6   : > { %p840_p5 = scmp.ne.s32.totalorder %s1285_s13, %s839_s26  ;;  %p844_p0 = scmp.lt.u32.totalorder %s1285_s13, %s1386_s4 }
  0xa7   : > { %p845_p12 = scmp.lt.u32.totalorder %s843_s11, %s839_s26  ;;  %p847_p7 = scmp.lt.u32.totalorder %s839_s26, %s1285_s13 }
  0xa8   : > { %p841_p4 = pnand %p840_p5, %p1402_p3 }
  0xa9   : > { %p846_p13 = por %p845_p12, %p844_p0 }
  0xaa   : > { %p842_p8 = pneg %p841_p4 }
  0xab   : > { %p848_p10 = por %p847_p7, %p846_p13 }
  0xad   : > { %p849_p9 = pnand %p848_p10, %p842_p8 }
  0xaf   : > { %852 = shalt.err (!%p849_p9)
}
  0xb0   : > { %651 = dma.vmem_to_hbm [thread:$0]  (%p1402_p3), %s1287_s6, 128, %s1285_s13, %s1236_s24, %s951_s9, %s951_s9, %s952_s12  }
  0xb1   : > { %s389_s25 = scalar_lea.sflag [#allocation4], %s1154_s14  ;;  %s853_s8 = scalar_lea.vmem %s1295_s7, 128 }
  0xb2   : > { %p854_p11 = scmp.ne.s32.totalorder %s1295_s7, %s853_s8  ;;  %s954_s18 = smov [#allocation7]  }
  0xb3   : > { %s857_s10 = sshll.u32 %s954_s18, 4  ;;  %s858_s10 = int_to_ptr.vmem [resolvable:$false] %s857_s10 }
  0xb4   : > { %p855_p1 = pnand %p854_p11, %p1402_p3  ;;  %s859_s26 = scalar_lea.vmem %s858_s10, 256 }
  0xb5   : > { %p860_p2 = scmp.lt.s32.totalorder %s1295_s7, %s858_s10  ;;  %p861_p5 = scmp.lt.s32.totalorder %s859_s26, %s853_s8 }
  0xb6   : > { %p856_p6 = pneg %p855_p1 }
  0xb7   : > { %p862_p4 = por %p861_p5, %p860_p2 }
  0xb9   : > { %p863_p8 = pnand %p862_p4, %p856_p6 }
  0xbb   : > { %866 = shalt.err (!%p863_p8)
}
  0xbc   : > { %s867_s24 = scalar_lea.hbm %s1293_s5, 128  ;;  %s871_s27 = scalar_lea.hbm %s1384_s2, 256 }
  0xbd   : > { %p868_p0 = scmp.ne.s32.totalorder %s1293_s5, %s867_s24  ;;  %p872_p7 = scmp.lt.u32.totalorder %s1293_s5, %s1384_s2 }
  0xbe   : > { %p873_p10 = scmp.lt.u32.totalorder %s871_s27, %s867_s24  ;;  %p875_p11 = scmp.lt.u32.totalorder %s867_s24, %s1293_s5 }
  0xbf   : > { %p869_p12 = pnand %p868_p0, %p1402_p3 }
  0xc0   : > { %p874_p9 = por %p873_p10, %p872_p7 }
  0xc1   : > { %p870_p13 = pneg %p869_p12 }
  0xc2   : > { %p876_p1 = por %p875_p11, %p874_p9 }
  0xc4   : > { %p877_p6 = pnand %p876_p1, %p870_p13 }
  0xc6   : > { %880 = shalt.err (!%p877_p6)
}
  0xc7   : > { %649 = dma.vmem_to_hbm [thread:$0]  (%p1402_p3), %s1295_s7, 128, %s1293_s5, %s389_s25, %s951_s9, %s951_s9, %s952_s12  }
  0xc8 PF: > { %s459_s21 = sand.u32 1, %s923_s15   ;;  %p1403_p2 = scmp.ne.s32.totalorder %s1395_s30, 0 }
  0xc9   : > { %p1404_p5 = scmp.ge.s32.totalorder %s943_s20, 2  ;;  %s460_s0 = scalar_lea.sflag [#allocation4], %s459_s21 }
  0xcb   : > { %p663_p4 = pnand %p1404_p5, %p1403_p2 }
  0xcd   : > { %914 = dma.done.wait (!%p663_p4), %s460_s0, 128  }
  0xce   : > { %916 = vsyncadd (!%p663_p4), %s460_s0, 4294967168  ;;  %s1405_s28 = sadd.s32 4294967294, %s943_s20  }
  0xcf   : > { %s468_s8 = sand.u32 1, %s1405_s28  }
  0xd0   : > { %s469_s18 = scalar_lea.sflag [#allocation9], %s468_s8 }
  0xd1   : > { %918 = dma.done.wait (!%p663_p4), %s469_s18, 256  }
  0xd2   : > { %920 = vsyncadd (!%p663_p4), %s469_s18, 4294967040  ;;  %s27_s20 = sadd.s32 1, %s943_s20   ;;  %s1406_s15 = smov %s927_s16 }
  0xd3   : > { %p24_p3 = scmp.ge.s32.totalorder %s27_s20, 4   ;;  %s1407_s16 = smov %s931_s17 }
  0xd4   : > { %s1408_s17 = smov %s1042_s29  ;;  %s1409_s18 = smov %s939_s19 }
  0xd5   : > { %s1410_s19 = smov %s1412_s23  ;;  %26 = sbr.rel (!%p24_p3) target bundleno = 12 (0xc), region = 122 }
  0xdc   :  { %483 = vsyncpa [#allocation3], 1 }
  0xdd   :  { %485 = vsyncpa [#allocation3 + $0x1], 1 }
  0xde   :  { %486 = vsyncpa [#allocation6], 1 }
  0xdf   :  { %488 = vsyncpa [#allocation6 + $0x1], 1 }
  0xe0   :  { %489 = vsyncpa [#allocation4], 1 }
  0xe1   :  { %491 = vsyncpa [#allocation4 + $0x1], 1 }
  0xe2   :  { %492 = vsyncpa [#allocation9], 1 }
  0xe3   :  { %494 = vsyncpa [#allocation9 + $0x1], 1 }

</bundles_post_ra>
